<compile_context>
chip_gen: v6e
topology: v6e:2x2x1
jax: 0.10.0
libtpu: 0.0.40
codegen_flags: <defaults>
</compile_context>

<pallas_src>
import jax
import jax.numpy as jnp
from jax.experimental import pallas as pl
from jax.experimental.pallas import tpu as pltpu


def _critic_kernel(s_ref, a_ref, w1s_ref, w1a_ref, b1_ref, w2_ref, b2_ref,
                   w3_ref, b3_ref, o_ref):
    # Layer 1: concat(state, action) @ W1 + b1  ==  state @ W1s + action @ W1a + b1
    h1 = (jnp.dot(s_ref[...], w1s_ref[...], preferred_element_type=jnp.float32)
          + jnp.dot(a_ref[...], w1a_ref[...], preferred_element_type=jnp.float32)
          + b1_ref[...])
    # ReLU, then drop to the weight dtype right away (exact for ReLU; halves the
    # [tile_b,128] intermediate on bf16 weights, no-op on f32 weights).
    h1 = jnp.maximum(h1, 0.0).astype(w2_ref.dtype)

    # Layer 2: [tile_b,128] @ [128,256], f32 accumulate.
    h2 = jnp.dot(h1, w2_ref[...], preferred_element_type=jnp.float32) + b2_ref[...]
    h2 = jnp.maximum(h2, 0.0).astype(w3_ref.dtype)

    # Layer 3 as [1,256] x [tile_b,256]^T -> [1, tile_b]  (lane-dense output row).
    # Contraction on dim 1 of h2 may lower through the XLU; XLU is idle in this
    # kernel, so that is free filler (verified structure, see perf notes).
    h3 = jax.lax.dot_general(
        w3_ref[...], h2,
        dimension_numbers=(((1,), (1,)), ((), ())),
        preferred_element_type=jnp.float32) + b3_ref[...]

    o_ref[0] = jnp.tanh(h3).astype(o_ref.dtype)                          # [1, tile_b]


def _pick_tile_b(B, tile_b=None, cap=2048):
    """Batch-tile selection for an overhead-bound tiny MLP.

    - B <= cap: single grid step (tile_b = B).  v5e/v6e have one TensorCore so a
      split only adds ~600-cycle step overhead; on v7x a split is only worth it
      once each core still gets a >= ~1024-row tile, i.e. B > cap.
    - B > cap: largest multiple-of-128 divisor of B that is <= cap (unmasked,
      full-lane stores on the [1,tile_b] output row); fall back to the largest
      multiple-of-8 divisor; as a last resort one full-extent block.
    """
    if tile_b is not None:
        return tile_b
    if B <= cap:
        return B
    t = (cap // 128) * 128
    while t >= 128 and B % t != 0:
        t -= 128
    if t >= 128:
        return t
    t = (cap // 8) * 8
    while t >= 8 and B % t != 0:
        t -= 8
    if t >= 8:
        return t
    return B  # degenerate batch size: single full-extent block


def critic_forward(state, action, params, *, tile_b=None):
    """state: [B, input_size], action: [B, output_size] -> tanh(Q) of shape [B, 1]."""
    w1s, w1a, b1, w2, b2, w3, b3 = params
    B, Ds = state.shape
    _, Da = action.shape
    H1 = w1s.shape[1]
    H2 = w2.shape[1]

    tile_b = _pick_tile_b(B, tile_b)
    assert B % tile_b == 0, "batch must be divisible by tile_b"
    assert tile_b == B or tile_b % 8 == 0, "tile_b must be a multiple of 8 (f32 sublane)"
    num_tiles = B // tile_b

    # Activations enter the MXU in the weights' dtype (f32 default; bf16 optional
    # on v6e/v7x).  Note: with bf16 params this also casts the raw inputs.
    state = state.astype(w1s.dtype)
    action = action.astype(w1a.dtype)

    out = pl.pallas_call(
        _critic_kernel,
        out_shape=jax.ShapeDtypeStruct((num_tiles, 1, tile_b), jnp.float32),
        grid_spec=pltpu.PrefetchScalarGridSpec(
            num_scalar_prefetch=0,
            grid=(num_tiles,),
            in_specs=[
                pl.BlockSpec((tile_b, Ds), lambda i: (i, 0)),   # state tile
                pl.BlockSpec((tile_b, Da), lambda i: (i, 0)),   # action tile
                pl.BlockSpec((Ds, H1), lambda i: (0, 0)),       # W1 rows for state (resident)
                pl.BlockSpec((Da, H1), lambda i: (0, 0)),       # W1 rows for action
                pl.BlockSpec((1, H1), lambda i: (0, 0)),        # b1
                pl.BlockSpec((H1, H2), lambda i: (0, 0)),       # W2
                pl.BlockSpec((1, H2), lambda i: (0, 0)),        # b2
                pl.BlockSpec((1, H2), lambda i: (0, 0)),        # W3 (stored as a row)
                pl.BlockSpec((1, 1), lambda i: (0, 0)),         # b3
            ],
            out_specs=pl.BlockSpec((1, 1, tile_b), lambda i: (i, 0, 0)),
        ),
        compiler_params=pltpu.CompilerParams(
            # Harmless on single-TC v5e/v6e; shards batch tiles across v7x cores
            # when the grid has >1 program (only for B > 2048 by default).
            dimension_semantics=("parallel",),
        ),
    )(state, action, w1s, w1a, b1, w2, b2, w3, b3)

    # Match the PyTorch module's [B, 1] output.  If the consumer can take a flat
    # [B] Q tensor, return out.reshape(B) instead and skip the relayout.
    return out.reshape(B, 1)


def init_params(key, input_size, output_size, dtype=jnp.float32):
    """PyTorch-style uniform(-1/sqrt(fan_in), 1/sqrt(fan_in)) init.
    Returns (W1_state, W1_action, b1, W2, b2, W3_row, b3): W1 pre-split into its
    state/action row blocks, W3 stored as a [1, 256] row, biases kept in f32.
    Use dtype=f32 on v5e (no bf16 VPU); bf16 is the v6e/v7x MXU fast path."""
    d_in = input_size + output_size
    dims = [(d_in, 128), (128, 256), (256, 1)]
    ws, bs = [], []
    for fan_in, fan_out in dims:
        key, kw, kb = jax.random.split(key, 3)
        bound = float(fan_in) ** -0.5
        ws.append(jax.random.uniform(kw, (fan_in, fan_out), jnp.float32, -bound, bound))
        bs.append(jax.random.uniform(kb, (1, fan_out), jnp.float32, -bound, bound))
    w1, w2, w3 = ws
    b1, b2, b3 = bs
    w1s, w1a = w1[:input_size], w1[input_size:]
    return (w1s.astype(dtype), w1a.astype(dtype), b1,
            w2.astype(dtype), b2,
            jnp.transpose(w3).astype(dtype), b3)


def _reference(state, action, params):
    w1s, w1a, b1, w2, b2, w3_row, b3 = params
    w1 = jnp.concatenate([w1s, w1a], axis=0).astype(jnp.float32)
    x = jnp.concatenate([state, action], axis=1)
    h1 = jnp.maximum(x @ w1 + b1, 0.0)
    h2 = jnp.maximum(h1 @ w2.astype(jnp.float32) + b2, 0.0)
    return jnp.tanh(h2 @ jnp.transpose(w3_row).astype(jnp.float32) + b3)


if __name__ == "__main__":
    key = jax.random.PRNGKey(0)
    input_size, output_size, batch = 16, 8, 8

    k1, k2, k3 = jax.random.split(key, 3)
    state = jax.random.normal(k1, (batch, input_size), jnp.float32)
    action = jax.random.normal(k2, (batch, output_size), jnp.float32)

    # --- f32 path, small batch: single-program full-extent block ---
    params = init_params(k3, input_size, output_size, dtype=jnp.float32)
    out = jax.block_until_ready(critic_forward(state, action, params))
    ref = _reference(state, action, params)
    assert out.shape == (batch, 1)
    assert jnp.allclose(out, ref, atol=5e-5, rtol=1e-5)

    # --- typical replay-buffer batch: default tiling -> one big tile (grid=1) ---
    batch_big = 256
    kb1, kb2 = jax.random.split(k1)
    state_b = jax.random.normal(kb1, (batch_big, input_size), jnp.float32)
    action_b = jax.random.normal(kb2, (batch_big, output_size), jnp.float32)
    out_b = jax.block_until_ready(critic_forward(state_b, action_b, params))
    ref_b = _reference(state_b, action_b, params)
    assert out_b.shape == (batch_big, 1)
    assert jnp.allclose(out_b, ref_b, atol=5e-5, rtol=1e-5)

    # --- explicit 128-row tiles: exercises grid > 1 (pipeline / megacore path) ---
    out_t = jax.block_until_ready(critic_forward(state_b, action_b, params, tile_b=128))
    assert out_t.shape == (batch_big, 1)
    assert jnp.allclose(out_t, ref_b, atol=5e-5, rtol=1e-5)

    # --- awkward batch size (40): single full-extent block, no 8-row cliff ---
    batch_odd = 40
    state_o = jax.random.normal(kb1, (batch_odd, input_size), jnp.float32)
    action_o = jax.random.normal(kb2, (batch_odd, output_size), jnp.float32)
    out_o = jax.block_until_ready(critic_forward(state_o, action_o, params))
    ref_o = _reference(state_o, action_o, params)
    assert out_o.shape == (batch_odd, 1)
    assert jnp.allclose(out_o, ref_o, atol=5e-5, rtol=1e-5)

    # --- bf16 weights/activations, f32 accumulation (v6e/v7x MXU fast path) ---
    params_bf16 = init_params(k3, input_size, output_size, dtype=jnp.bfloat16)
    out_bf16 = jax.block_until_ready(critic_forward(state, action, params_bf16))
    assert out_bf16.shape == (batch, 1)
    assert jnp.allclose(out_bf16, ref, atol=5e-2)

    print("KERNEL_OK")
</pallas_src>

<mosaic_0001>
module attributes {stable_mosaic.version = 11 : i64} {
  func.func @_critic_kernel(%arg0: i32, %arg1: memref<8x16xf32, #tpu.memory_space<vmem>>, %arg2: memref<8x8xf32, #tpu.memory_space<vmem>>, %arg3: memref<16x128xf32, #tpu.memory_space<vmem>>, %arg4: memref<8x128xf32, #tpu.memory_space<vmem>>, %arg5: memref<1x128xf32, #tpu.memory_space<vmem>>, %arg6: memref<128x256xf32, #tpu.memory_space<vmem>>, %arg7: memref<1x256xf32, #tpu.memory_space<vmem>>, %arg8: memref<1x256xf32, #tpu.memory_space<vmem>>, %arg9: memref<1x1xf32, #tpu.memory_space<vmem>>, %arg10: memref<1x1x8xf32, #tpu.memory_space<vmem>>) attributes {dimension_semantics = [#tpu.dimension_semantics<parallel>], iteration_bounds = array<i64: 1>, scalar_prefetch = 0 : i64, scratch_operands = 0 : i64, tpu.core_type = #tpu.core_type<tc>, window_params = [{transform_indices = @transform_0, window_bounds = array<i64: 8, 16>}, {transform_indices = @transform_1, window_bounds = array<i64: 8, 8>}, {pipeline_mode = #tpu.pipeline_mode<synchronous>, transform_indices = @transform_2, window_bounds = array<i64: 16, 128>}, {pipeline_mode = #tpu.pipeline_mode<synchronous>, transform_indices = @transform_3, window_bounds = array<i64: 8, 128>}, {pipeline_mode = #tpu.pipeline_mode<synchronous>, transform_indices = @transform_4, window_bounds = array<i64: 1, 128>}, {pipeline_mode = #tpu.pipeline_mode<synchronous>, transform_indices = @transform_5, window_bounds = array<i64: 128, 256>}, {pipeline_mode = #tpu.pipeline_mode<synchronous>, transform_indices = @transform_6, window_bounds = array<i64: 1, 256>}, {pipeline_mode = #tpu.pipeline_mode<synchronous>, transform_indices = @transform_7, window_bounds = array<i64: 1, 256>}, {pipeline_mode = #tpu.pipeline_mode<synchronous>, transform_indices = @transform_8, window_bounds = array<i64: 1, 1>}, {transform_indices = @transform_9, window_bounds = array<i64: 1, 1, 8>}]} {
    %c0 = arith.constant 0 : index
    %c0_0 = arith.constant 0 : index
    %0 = vector.load %arg1[%c0, %c0_0] : memref<8x16xf32, #tpu.memory_space<vmem>>, vector<8x16xf32>
    %c0_1 = arith.constant 0 : index
    %c0_2 = arith.constant 0 : index
    %1 = vector.load %arg3[%c0_1, %c0_2] : memref<16x128xf32, #tpu.memory_space<vmem>>, vector<16x128xf32>
    %cst = arith.constant dense<0.000000e+00> : vector<8x128xf32>
    %2 = tpu.matmul %0, %1, %cst {dimension_numbers = #tpu.dot_dimension_numbers<[1], [0], [0], [1], [0, 0, 1, 1], [], []>} : vector<8x16xf32>, vector<16x128xf32>, vector<8x128xf32> -> vector<8x128xf32>
    %c0_3 = arith.constant 0 : index
    %c0_4 = arith.constant 0 : index
    %3 = vector.load %arg2[%c0_3, %c0_4] : memref<8x8xf32, #tpu.memory_space<vmem>>, vector<8x8xf32>
    %c0_5 = arith.constant 0 : index
    %c0_6 = arith.constant 0 : index
    %4 = vector.load %arg4[%c0_5, %c0_6] : memref<8x128xf32, #tpu.memory_space<vmem>>, vector<8x128xf32>
    %cst_7 = arith.constant dense<0.000000e+00> : vector<8x128xf32>
    %5 = tpu.matmul %3, %4, %cst_7 {dimension_numbers = #tpu.dot_dimension_numbers<[1], [0], [0], [1], [0, 0, 1, 1], [], []>} : vector<8x8xf32>, vector<8x128xf32>, vector<8x128xf32> -> vector<8x128xf32>
    %6 = arith.addf %2, %5 : vector<8x128xf32>
    %c0_8 = arith.constant 0 : index
    %c0_9 = arith.constant 0 : index
    %7 = vector.load %arg5[%c0_8, %c0_9] : memref<1x128xf32, #tpu.memory_space<vmem>>, vector<1x128xf32>
    %8 = vector.broadcast %7 : vector<1x128xf32> to vector<8x128xf32>
    %9 = arith.addf %6, %8 : vector<8x128xf32>
    %cst_10 = arith.constant 0.000000e+00 : f32
    %10 = vector.broadcast %cst_10 : f32 to vector<8x128xf32>
    %11 = arith.maximumf %9, %10 : vector<8x128xf32>
    %c0_11 = arith.constant 0 : index
    %c0_12 = arith.constant 0 : index
    %12 = vector.load %arg6[%c0_11, %c0_12] : memref<128x256xf32, #tpu.memory_space<vmem>>, vector<128x256xf32>
    %cst_13 = arith.constant dense<0.000000e+00> : vector<8x256xf32>
    %13 = tpu.matmul %11, %12, %cst_13 {dimension_numbers = #tpu.dot_dimension_numbers<[1], [0], [0], [1], [0, 0, 1, 1], [], []>} : vector<8x128xf32>, vector<128x256xf32>, vector<8x256xf32> -> vector<8x256xf32>
    %c0_14 = arith.constant 0 : index
    %c0_15 = arith.constant 0 : index
    %14 = vector.load %arg7[%c0_14, %c0_15] : memref<1x256xf32, #tpu.memory_space<vmem>>, vector<1x256xf32>
    %15 = vector.broadcast %14 : vector<1x256xf32> to vector<8x256xf32>
    %16 = arith.addf %13, %15 : vector<8x256xf32>
    %cst_16 = arith.constant 0.000000e+00 : f32
    %17 = vector.broadcast %cst_16 : f32 to vector<8x256xf32>
    %18 = arith.maximumf %16, %17 : vector<8x256xf32>
    %c0_17 = arith.constant 0 : index
    %c0_18 = arith.constant 0 : index
    %19 = vector.load %arg8[%c0_17, %c0_18] : memref<1x256xf32, #tpu.memory_space<vmem>>, vector<1x256xf32>
    %cst_19 = arith.constant dense<0.000000e+00> : vector<1x8xf32>
    %20 = tpu.matmul %19, %18, %cst_19 {dimension_numbers = #tpu.dot_dimension_numbers<[1], [1], [0], [0], [0, 0, 1, 0], [], []>} : vector<1x256xf32>, vector<8x256xf32>, vector<1x8xf32> -> vector<1x8xf32>
    %c0_20 = arith.constant 0 : index
    %c0_21 = arith.constant 0 : index
    %21 = vector.load %arg9[%c0_20, %c0_21] : memref<1x1xf32, #tpu.memory_space<vmem>>, vector<1x1xf32>
    %22 = vector.broadcast %21 : vector<1x1xf32> to vector<1x8xf32>
    %23 = arith.addf %20, %22 : vector<1x8xf32>
    %24 = math.tanh %23 : vector<1x8xf32>
    %c0_22 = arith.constant 0 : index
    %c0_23 = arith.constant 0 : index
    %c0_24 = arith.constant 0 : index
    %25 = vector.load %arg10[%c0_22, %c0_23, %c0_24] : memref<1x1x8xf32, #tpu.memory_space<vmem>>, vector<1x1x8xf32>
    %26 = vector.shape_cast %25 : vector<1x1x8xf32> to vector<1x8xf32>
    %27 = vector.shape_cast %24 : vector<1x8xf32> to vector<1x1x8xf32>
    tpu.vector_store %arg10[%c0_22, %c0_23, %c0_24], %27 {strides = array<i32>} : memref<1x1x8xf32, #tpu.memory_space<vmem>>, vector<1x1x8xf32>,
    return
  }
  func.func @transform_0(%arg0: i32) -> (i32, i32) {
    %c0_i32 = arith.constant 0 : i32
    %c0_i32_0 = arith.constant 0 : i32
    return %arg0, %c0_i32 : i32, i32
  }
  func.func @transform_1(%arg0: i32) -> (i32, i32) {
    %c0_i32 = arith.constant 0 : i32
    %c0_i32_0 = arith.constant 0 : i32
    return %arg0, %c0_i32 : i32, i32
  }
  func.func @transform_2(%arg0: i32) -> (i32, i32) {
    %c0_i32 = arith.constant 0 : i32
    %c0_i32_0 = arith.constant 0 : i32
    %c0_i32_1 = arith.constant 0 : i32
    return %c0_i32, %c0_i32_0 : i32, i32
  }
  func.func @transform_3(%arg0: i32) -> (i32, i32) {
    %c0_i32 = arith.constant 0 : i32
    %c0_i32_0 = arith.constant 0 : i32
    %c0_i32_1 = arith.constant 0 : i32
    return %c0_i32, %c0_i32_0 : i32, i32
  }
  func.func @transform_4(%arg0: i32) -> (i32, i32) {
    %c0_i32 = arith.constant 0 : i32
    %c0_i32_0 = arith.constant 0 : i32
    %c0_i32_1 = arith.constant 0 : i32
    return %c0_i32, %c0_i32_0 : i32, i32
  }
  func.func @transform_5(%arg0: i32) -> (i32, i32) {
    %c0_i32 = arith.constant 0 : i32
    %c0_i32_0 = arith.constant 0 : i32
    %c0_i32_1 = arith.constant 0 : i32
    return %c0_i32, %c0_i32_0 : i32, i32
  }
  func.func @transform_6(%arg0: i32) -> (i32, i32) {
    %c0_i32 = arith.constant 0 : i32
    %c0_i32_0 = arith.constant 0 : i32
    %c0_i32_1 = arith.constant 0 : i32
    return %c0_i32, %c0_i32_0 : i32, i32
  }
  func.func @transform_7(%arg0: i32) -> (i32, i32) {
    %c0_i32 = arith.constant 0 : i32
    %c0_i32_0 = arith.constant 0 : i32
    %c0_i32_1 = arith.constant 0 : i32
    return %c0_i32, %c0_i32_0 : i32, i32
  }
  func.func @transform_8(%arg0: i32) -> (i32, i32) {
    %c0_i32 = arith.constant 0 : i32
    %c0_i32_0 = arith.constant 0 : i32
    %c0_i32_1 = arith.constant 0 : i32
    return %c0_i32, %c0_i32_0 : i32, i32
  }
  func.func @transform_9(%arg0: i32) -> (i32, i32, i32) {
    %c0_i32 = arith.constant 0 : i32
    %c0_i32_0 = arith.constant 0 : i32
    %c0_i32_1 = arith.constant 0 : i32
    return %arg0, %c0_i32, %c0_i32_0 : i32, i32, i32
  }
}

</mosaic_0001>

<bundles_post_ra>
// kernel: tpu_custom_call.1
= control target key start
LH: loop header
LB: loop body
LE: loop exit
PB: predicated region body
PF: predicated region fallthrough
CT: control target
= control target key end

     0   :  { %s745_s0 = inlined_call_operand.hbm [shape: f32[8,16], index: 0, kind: input, shape index: {}]   ;;  %s746_s1 = inlined_call_operand.hbm [shape: f32[8,8], index: 1, kind: input, shape index: {}]   ;;  %s747_s2 = inlined_call_operand.hbm [shape: f32[16,128], index: 2, kind: input, shape index: {}]   ;;  %s748_s3 = inlined_call_operand.hbm [shape: f32[8,128], index: 3, kind: input, shape index: {}]   ;;  %s749_s4 = inlined_call_operand.vmem [shape: f32[1,128], index: 4, kind: input, shape index: {}]   ;;  %s750_s5 = inlined_call_operand.hbm [shape: f32[128,256], index: 5, kind: input, shape index: {}]   ;;  %s751_s6 = inlined_call_operand.vmem [shape: f32[1,256], index: 6, kind: input, shape index: {}]   ;;  %s752_s7 = inlined_call_operand.vmem [shape: f32[1,256], index: 7, kind: input, shape index: {}]   ;;  %s753_s8 = inlined_call_operand.<no memory space> [shape: f32[1,1], index: 8, kind: input, shape index: {}]   ;;  %s754_s9 = inlined_call_operand.hbm [shape: f32[1,1,8], index: 9, kind: output, shape index: {}]  }
   0x1   :  { %v14_v0 = vstv %s753_s8 }
   0x2   :  { %15 = vst [vmem:[#allocation2] sm:$0x1] %v14_v0 }
   0x3   :  { %16 = vsyncpa [#allocation4], 0 }
   0x4   :  { %17 = vsyncpa [#allocation7], 0 }
   0x5   :  { %18 = vsyncpa [#allocation10], 0 }
   0x6   :  { %19 = vsyncpa [#allocation5], 0  ;;  %s652_s11 = smov [#allocation6]   ;;  %s653_s13 = smov [#allocation9]  }
   0x7   :  { %s36_s12 = sshll.u32 %s652_s11, 4  ;;  %s58_s14 = sshll.u32 %s653_s13, 4  ;;  %s37_s12 = int_to_ptr.vmem [resolvable:$true] %s36_s12  ;;  %s59_s14 = int_to_ptr.vmem [resolvable:$true] %s58_s14 }
   0x8   :  { %s532_s15 = scalar_lea.vmem %s37_s12, 128  ;;  %p537_p1 = scmp.lt.s32.totalorder %s37_s12, %s37_s12 }
   0x9   :  { %p533_p0 = scmp.ne.s32.totalorder %s37_s12, %s532_s15  ;;  %p538_p2 = scmp.lt.s32.totalorder %s532_s15, %s532_s15 }
   0xb   :  { %p539_p3 = por %p538_p2, %p537_p1 }
   0xd   :  { %p540_p4 = pnand %p539_p3, %p533_p0 }
   0xf   :  { %543 = shalt.err (!%p540_p4)
}
  0x10   :  { %39 = dma.hbm_to_vmem [thread:$0]  %s746_s1, 128, %s37_s12, [#allocation7]  }
  0x11   :  { %s552_s17 = scalar_lea.vmem %s59_s14, 128  ;;  %p557_p6 = scmp.lt.s32.totalorder %s59_s14, %s59_s14 }
  0x12   :  { %p553_p5 = scmp.ne.s32.totalorder %s59_s14, %s552_s17  ;;  %p558_p7 = scmp.lt.s32.totalorder %s552_s17, %s552_s17 }
  0x14   :  { %p559_p8 = por %p558_p7, %p557_p6 }
  0x16   :  { %p560_p9 = pnand %p559_p8, %p553_p5 }
  0x18   :  { %563 = shalt.err (!%p560_p9)
}
  0x19   :  { %61 = dma.hbm_to_vmem [thread:$0]  %s748_s3, 128, %s59_s14, [#allocation10]  }
  0x1a   :  { %s654_s20 = smov [#allocation3]   ;;  %s655_s22 = smov [#allocation8]  }
  0x1b   :  { %s26_s21 = sshll.u32 %s654_s20, 4  ;;  %s45_s23 = sshll.u32 %s655_s22, 4  ;;  %s27_s21 = int_to_ptr.vmem [resolvable:$true] %s26_s21  ;;  %s46_s23 = int_to_ptr.vmem [resolvable:$true] %s45_s23 }
  0x1c   :  { %s572_s24 = scalar_lea.vmem %s27_s21, 128  ;;  %p577_p11 = scmp.lt.s32.totalorder %s27_s21, %s27_s21 }
  0x1d   :  { %p573_p10 = scmp.ne.s32.totalorder %s27_s21, %s572_s24  ;;  %p578_p12 = scmp.lt.s32.totalorder %s572_s24, %s572_s24 }
  0x1f   :  { %p579_p13 = por %p578_p12, %p577_p11 }
  0x21   :  { %p580_p0 = pnand %p579_p13, %p573_p10 }
  0x23   :  { %583 = shalt.err (!%p580_p0)
}
  0x24   :  { %29 = dma.hbm_to_vmem [thread:$0]  %s745_s0, 128, %s27_s21, [#allocation4]  }
  0x25   :  { %s592_s26 = scalar_lea.vmem %s46_s23, 256  ;;  %p597_p2 = scmp.lt.s32.totalorder %s46_s23, %s46_s23 }
  0x26   :  { %p593_p1 = scmp.ne.s32.totalorder %s46_s23, %s592_s26  ;;  %p598_p3 = scmp.lt.s32.totalorder %s592_s26, %s592_s26 }
  0x28   :  { %p599_p4 = por %p598_p3, %p597_p2 }
  0x2a   :  { %p600_p5 = pnand %p599_p4, %p593_p1 }
  0x2c   :  { %603 = shalt.err (!%p600_p5)
}
  0x2d   :  { %s656_s3 = smov 128   ;;  %s657_s27 = smov 8  }
  0x2e   :  { %51 = dma.hbm_to_vmem [thread:$0]  %s747_s2, 256, %s46_s23, [#allocation7], %s656_s3, %s656_s3, %s657_s27  }
  0x2f   :  { %s658_s30 = smov [#allocation11]  }
  0x30   :  { %s69_s10 = sshll.u32 %s658_s30, 4  ;;  %s70_s10 = int_to_ptr.vmem [resolvable:$true] %s69_s10 }
  0x31   :  { %s612_s11 = scalar_lea.vmem %s70_s10, 4096  ;;  %p617_p7 = scmp.lt.s32.totalorder %s70_s10, %s70_s10 }
  0x32   :  { %p613_p6 = scmp.ne.s32.totalorder %s70_s10, %s612_s11  ;;  %p618_p8 = scmp.lt.s32.totalorder %s612_s11, %s612_s11 }
  0x34   :  { %p619_p9 = por %p618_p8, %p617_p7 }
  0x36   :  { %p620_p10 = pnand %p619_p9, %p613_p6 }
  0x38   :  { %623 = shalt.err (!%p620_p10)
}
  0x39   :  { %s659_s0 = smov 256   ;;  %s660_s12 = smov 16  }
  0x3a   :  { %75 = dma.hbm_to_vmem [thread:$0]  %s750_s5, 4096, %s70_s10, [#allocation10], %s659_s0, %s659_s0, %s660_s12  }
  0x3b   :  { %644 = dma.done.wait [#allocation4], 128  }
  0x3c   :  { %645 = vsyncadd [#allocation4], 4294967168 }
  0x3d   :  { %646 = dma.done.wait [#allocation7], 384  }
  0x3e   :  { %647 = vsyncadd [#allocation7], 4294966912 }
  0x3f   :  { %648 = dma.done.wait [#allocation10], 4224  }
  0x40   :  { %649 = vsyncadd [#allocation10], 4294963072  ;;  %v661_v1 = vmov 0.0   ;;  %vm662_vm0 = vmmov 0   ;;  %vm102_vm1 = vcmask 64512   ;;  %v101_v2 = vld [vmem:[#allocation9] sm:$0xff]  ;;  %v293_v47 = vlaneseq }
  0x41   :  { %496 = vmatprep.subr.mxu1 %v661_v1  ;;  %498 = vmatprep.mubr.msk.f32.mxu1 %vm662_vm0, %v661_v1  ;;  %v100_v3 = vld [vmem:[#allocation6] sm:$0xff]  ;;  %v99_v4 = vld [vmem:[#allocation8 + $0x8] sm:$0xff]  ;;  %v290_v5 = vld [vmem:[#allocation11 + $0xf8] sm:$0xff]  ;;  %vm176_vm2 = vcmask 130048   ;;  %v663_v53 = vmov 0   ;;  %vm469_vm3 = vcmask 57344  }
  0x42   :  { %367 = vmatprep.mubr.f32.mxu0 %v661_v1  ;;  %497 = vmatpush3.msra.mxu1 %v101_v2  ;;  %v98_v6 = vld [vmem:[#allocation8] sm:$0xff]  ;;  %v289_v7 = vld [vmem:[#allocation11 + $0xf0] sm:$0xff]  ;;  %v97_v8 = vld [vmem:[#allocation3] sm:$0xff]  ;;  %v294_v48 = vshrl.u32 %v293_v47, 7 }
  0x43   :  { %499 = vmatmul.mubr.msk.f32.vlgmr.msra.gmra.mxu1 %vm102_vm1, %v100_v3  ;;  %501 = vmatprep.subr.mxu1 %v661_v1  ;;  %v288_v9 = vld [vmem:[#allocation11 + $0xe8] sm:$0xff]  ;;  %v287_v10 = vld [vmem:[#allocation11 + $0xe0] sm:$0xff]  ;;  %v286_v11 = vld [vmem:[#allocation11 + $0xd8] sm:$0xff] }
  0x44   :  { %502 = vmatpush3.msra.mxu1 %v99_v4  ;;  %505 = vmatprep.mubr.msk.f32.mxu1 %vm662_vm0, %v661_v1  ;;  %v285_v12 = vld [vmem:[#allocation11 + $0xd0] sm:$0xff]  ;;  %v284_v13 = vld [vmem:[#allocation11 + $0xc8] sm:$0xff]  ;;  %v283_v14 = vld [vmem:[#allocation11 + $0xc0] sm:$0xff]  ;;  %v299_v49 = vsub.s32 1, %v294_v48  ;;  %v295_v54 = vsub.s32 0, %v294_v48 }
  0x45   :  { %503 = vmatprep.subr.mxu1 %v661_v1  ;;  %303 = vmatprep.subr.mxu0 %v290_v5  ;;  %v282_v15 = vld [vmem:[#allocation11 + $0xb8] sm:$0xff]  ;;  %v281_v16 = vld [vmem:[#allocation11 + $0xb0] sm:$0xff]  ;;  %v280_v17 = vld [vmem:[#allocation11 + $0xa8] sm:$0xff] }
  0x46   :  { %504 = vmatpush3.msra.mxu1 %v98_v6  ;;  %304 = vmatpush1.msra.mxu0 %v289_v7  ;;  %v279_v18 = vld [vmem:[#allocation11 + $0xa0] sm:$0xff]  ;;  %v278_v19 = vld [vmem:[#allocation11 + $0x98] sm:$0xff]  ;;  %v277_v20 = vld [vmem:[#allocation11 + $0x90] sm:$0xff] }
  0x47   :  { %506 = vmatmul.mubr.msk.f32.vlgmr.msra.gmra.mxu1 %vm176_vm2, %v97_v8  ;;  %305 = vmatprep.subr.mxu0 %v288_v9  ;;  %v276_v21 = vld [vmem:[#allocation11 + $0x88] sm:$0xff]  ;;  %v275_v22 = vld [vmem:[#allocation11 + $0x80] sm:$0xff]  ;;  %v274_v23 = vld [vmem:[#allocation11 + $0x78] sm:$0xff] }
  0x48   :  { %306 = vmatpush1.msra.mxu0 %v287_v10  ;;  %v273_v24 = vld [vmem:[#allocation11 + $0x70] sm:$0xff]  ;;  %v272_v25 = vld [vmem:[#allocation11 + $0x68] sm:$0xff]  ;;  %v271_v26 = vld [vmem:[#allocation11 + $0x60] sm:$0xff]  ;;  %521 = vset.pattern.permute.xlu0 %v663_v53 }
  0x49   :  { %307 = vmatprep.subr.mxu0 %v286_v11  ;;  %v270_v27 = vld [vmem:[#allocation11 + $0x58] sm:$0xff]  ;;  %v269_v28 = vld [vmem:[#allocation11 + $0x50] sm:$0xff]  ;;  %v268_v29 = vld [vmem:[#allocation11 + $0x48] sm:$0xff] }
  0x4a   :  { %308 = vmatpush1.msra.mxu0 %v285_v12  ;;  %v267_v30 = vld [vmem:[#allocation11 + $0x40] sm:$0xff]  ;;  %v266_v31 = vld [vmem:[#allocation11 + $0x38] sm:$0xff]  ;;  %v265_v32 = vld [vmem:[#allocation11 + $0x30] sm:$0xff] }
  0x4b   :  { %309 = vmatprep.subr.mxu0 %v284_v13  ;;  %v264_v33 = vld [vmem:[#allocation11 + $0x28] sm:$0xff]  ;;  %v263_v34 = vld [vmem:[#allocation11 + $0x20] sm:$0xff]  ;;  %v262_v35 = vld [vmem:[#allocation11 + $0x18] sm:$0xff] }
  0x4c   :  { %310 = vmatpush1.msra.mxu0 %v283_v14  ;;  %v261_v36 = vld [vmem:[#allocation11 + $0x10] sm:$0xff]  ;;  %v260_v37 = vld [vmem:[#allocation11 + $0x8] sm:$0xff]  ;;  %v259_v38 = vld [vmem:[#allocation11] sm:$0xff] }
  0x4d   :  { %311 = vmatprep.subr.mxu0 %v282_v15  ;;  %v490_v42 = vld [vmem:[%s749_s4] ss:$0 sm:$0xff] }
  0x4e   :  { %312 = vmatpush1.msra.mxu0 %v281_v16  ;;  %v376_v50 = vld [vmem:[%s752_s7] sm:$0x3]  ;;  %s664_s7 = smov [#allocation12]  }
  0x4f   :  { %313 = vmatprep.subr.mxu0 %v280_v17  ;;  %v395_v51 = vrot.slane %v376_v50, %v299_v49  ;;  %v377_v52 = vld [vmem:[#allocation2] sm:$0x1]  ;;  %v391_v0 = vrot.slane %v376_v50, %v295_v54 }
  0x50   :  { %314 = vmatpush1.msra.mxu0 %v279_v18  ;;  %380 = vperm.xlu0 %521, %v377_v52   ;;  %v291_v55 = vld [vmem:[%s751_s6] sm:$0x3]  ;;  %s477_s6 = sshll.u32 %s664_s7, 4  ;;  %s478_s6 = int_to_ptr.vmem [resolvable:$true] %s477_s6 }
  0x51   :  { %315 = vmatprep.subr.mxu0 %v278_v19  ;;  %462 = vmatprep.mubr.f32.mxu1 %v395_v51  ;;  %v296_v56 = vrot.slane %v291_v55, %v295_v54  ;;  %v300_v57 = vrot.slane %v291_v55, %v299_v49  ;;  %s624_s17 = scalar_lea.vmem %s478_s6, 16  ;;  %s628_s18 = scalar_lea.vmem %s478_s6, 32 }
  0x52   :  { %316 = vmatpush1.msra.mxu0 %v277_v20  ;;  %p625_p11 = scmp.ne.s32.totalorder %s478_s6, %s624_s17  ;;  %p629_p12 = scmp.lt.s32.totalorder %s478_s6, %s478_s6 }
  0x53   :  { %317 = vmatprep.subr.mxu0 %v276_v21  ;;  %p630_p13 = scmp.lt.s32.totalorder %s628_s18, %s624_s17 }
  0x54   :  { %318 = vmatpush1.msra.mxu0 %v275_v22 }
  0x55   :  { %319 = vmatprep.subr.mxu0 %v274_v23  ;;  %p631_p0 = por %p630_p13, %p629_p12 }
  0x56   :  { %320 = vmatpush1.msra.mxu0 %v273_v24 }
  0x57   :  { %321 = vmatprep.subr.mxu0 %v272_v25  ;;  %p632_p1 = pnand %p631_p0, %p625_p11 }
  0x58   :  { %322 = vmatpush1.msra.mxu0 %v271_v26 }
  0x59   :  { %323 = vmatprep.subr.mxu0 %v270_v27 }
  0x5a   :  { %324 = vmatpush1.msra.mxu0 %v269_v28 }
  0x5b   :  { %325 = vmatprep.subr.mxu0 %v268_v29 }
  0x5c   :  { %326 = vmatpush1.msra.mxu0 %v267_v30 }
  0x5d   :  { %327 = vmatprep.subr.mxu0 %v266_v31 }
  0x5e   :  { %328 = vmatpush1.msra.mxu0 %v265_v32 }
  0x5f   :  { %329 = vmatprep.subr.mxu0 %v264_v33 }
  0x60   :  { %330 = vmatpush1.msra.mxu0 %v263_v34 }
  0x61   :  { %331 = vmatprep.subr.mxu0 %v262_v35 }
  0x62   :  { %332 = vmatpush1.msra.mxu0 %v261_v36 }
  0x63   :  { %333 = vmatprep.subr.mxu0 %v260_v37 }
  0x64   :  { %334 = vmatpush1.msra.mxu0 %v259_v38 }
  0xcb   :  { %v381_v1 = vpop.permute.xlu0 %380 }
  0xcc   :  { %v386_v2 = vrot.slane %v381_v1, %v295_v54 }
 0x103   :  { %v172_v39 = vpop.f32.mrf.mxu1 }
 0x105   :  { %v500_v40 = vpop.f32.mrf.mxu1 }
 0x107   :  { %v246_v41 = vpop.f32.mrf.mxu1 }
 0x108   :  { %v247_v43 = vadd.f32 %v246_v41, %v172_v39 }
 0x109   :  { %v507_v44 = vpop.f32.mrf.mxu1 }
 0x10a   :  { %v257_v45 = vadd.f32 %v490_v42, %v247_v43 }
 0x10c   :  { %v258_v46 = vmax.f32 %v257_v45, 0.0 }
 0x10e   :  { %368 = vmatmul.mubr.f32.vlgmr.msra.gmra.mxu0 %v258_v46 }
 0x1ce   :  { %v369_v58 = vpop.f32.mrf.mxu0 }
 0x1cf   :  { %v370_v59 = vadd.f32 %v369_v58, %v296_v56 }
 0x1d0   :  { %v371_v60 = vpop.f32.mrf.mxu0 }
 0x1d1   :  { %v372_v61 = vadd.f32 %v371_v60, %v300_v57  ;;  %v374_v63 = vmax.f32 %v370_v59, 0.0 }
 0x1d3   :  { %v375_v62 = vmax.f32 %v372_v61, 0.0 }
 0x1d5   :  { %428 = vmatprep.subr.mxu1 %v375_v62 }
 0x1d6   :  { %429 = vmatpush1.xpose.msra.mxu1 %v374_v63 }
 0x1d9   :  { %463 = vmatmul.mubr.f32.vlgmr.msra.gmra.mxu1 %v391_v0 }
 0x299   :  { %v464_v3 = vpop.f32.mrf.mxu1 }
 0x29a   :  { %v465_v4 = vadd.f32 %v464_v3, %v386_v2 }
 0x29b   :  { %v466_v5 = vpop.f32.mrf.mxu1 }
 0x29c   :  { %522 = vtanh.f32 %v465_v4 }
 0x2a9   :  { %v523_v6 = vpop.eup %522 }
 0x2aa   :  { %470 = vst.msk [vmem:[#allocation12] sm:$0x1] %vm469_vm3, %v523_v6 }
 0x2ab   :  { %635 = shalt.err (!%p632_p1)
}
 0x2ac   :  { %480 = dma.vmem_to_hbm [thread:$0]  %s478_s6, 16, %s754_s9, [#allocation5]  }
 0x2ad   :  { %650 = dma.done.wait [#allocation5], 16  }
 0x2ae   :  { %651 = vsyncadd [#allocation5], 4294967280 }
 0x2af   :  { %484 = vsyncpa [#allocation4], 1 }
 0x2b0   :  { %485 = vsyncpa [#allocation7], 1 }
 0x2b1   :  { %486 = vsyncpa [#allocation10], 1 }
 0x2b2   :  { %487 = vsyncpa [#allocation5], 1 }

</bundles_post_ra>
